<compile_context>
chip_gen: v5e
topology: v5e:2x2
jax: 0.10.0
libtpu: 0.0.40
codegen_flags: <defaults>
</compile_context>

<pallas_src>
import jax
import jax.numpy as jnp
from jax.experimental import pallas as pl
from jax.experimental.pallas import tpu as pltpu


# ----------------------------- fused Pallas kernel -----------------------------

def cnn_agent_fused_kernel(pT_ref, wcT_ref, bc_ref, w1_ref, b1_ref,
                           w2_ref, b2_ref, o_ref):
    # pT_ref : (1, 9*Cin, H*W)   im2col patches for this sample (contraction-major)
    # wcT_ref: (Cout, 9*Cin)     conv weight, taps flattened (weight-stationary)
    # bc_ref : (Cout, 1)
    # w1_ref : (Cout*H*W, Hid)   torch-native (channel-major) row ordering
    # b1_ref : (1, Hid)          w2_ref: (Hid, A)   b2_ref: (1, A)
    # o_ref  : (1, 1, A)

    # --- 3x3 conv + bias: ONE K=36 matmul, spatial dim lane-dense ---
    patches_t = pT_ref[0]                                             # (36, HW)
    conv_t = jnp.dot(wcT_ref[...], patches_t,
                     preferred_element_type=jnp.float32) + bc_ref[...]  # (Cout, HW)
    cout, hw = conv_t.shape

    # --- torch.nn.Flatten (channel-major) folded into linear1 ---
    # Place channel row c into lane block [c*HW, (c+1)*HW) of a (Cout, Cout*HW)
    # block-diagonal matrix (lane-aligned concat + iota mask: no reshapes, no
    # unaligned slices).  Then sum_rows(placed @ w1) == flat_torch @ w1.
    tiled = jnp.concatenate([conv_t] * cout, axis=1)                  # (Cout, Cout*HW)
    row = jax.lax.broadcasted_iota(jnp.int32, tiled.shape, 0)
    col = jax.lax.broadcasted_iota(jnp.int32, tiled.shape, 1)
    placed = jnp.where((col >= row * hw) & (col < (row + 1) * hw), tiled, 0.0)

    hmat = jnp.dot(placed, w1_ref[...],
                   preferred_element_type=jnp.float32)                # (Cout, Hid)
    h = jax.nn.sigmoid(jnp.sum(hmat, axis=0, keepdims=True) + b1_ref[...])  # (1, Hid)

    # --- linear2 + sigmoid ---
    y = jax.nn.sigmoid(jnp.dot(h, w2_ref[...],
                               preferred_element_type=jnp.float32) + b2_ref[...])  # (1, A)
    o_ref[0] = y


# --------------------------------- wrapper ---------------------------------

def _im2col_transposed(x_nchw):
    """(N, Cin, H, W) -> (N, 9*Cin, H*W), q = (kh*3+kw)*Cin + ci, p = h*W + w."""
    N, Cin, H, W = x_nchw.shape
    xp = jnp.pad(x_nchw, ((0, 0), (0, 0), (1, 1), (1, 1)))
    cols = []
    for kh in range(3):
        for kw in range(3):
            cols.append(xp[:, :, kh:kh + H, kw:kw + W].reshape(N, Cin, H * W))
    return jnp.concatenate(cols, axis=1)


@jax.jit
def cnn_agent_forward(x_nchw, params):
    """Pallas implementation of CNNAgent.forward (vis_rep_size branch)."""
    wc, bc, w1, b1, w2, b2 = (params["w_conv"], params["b_conv"],
                              params["w1"], params["b1"],
                              params["w2"], params["b2"])
    N, Cin, H, W = x_nchw.shape
    Cout = wc.shape[0]
    HW = H * W
    QK = 9 * Cin
    F = Cout * HW
    Hid = w1.shape[1]
    A = w2.shape[1]

    # Input-side layout plumbing (XLA glue, tiny): im2col patches + weight flattening.
    patches_t = _im2col_transposed(x_nchw)                       # (N, 9*Cin, HW)
    wc_t = jnp.transpose(wc, (0, 2, 3, 1)).reshape(Cout, QK)     # (Cout, 9*Cin)
    bc_col = bc.reshape(Cout, 1)
    b1_row = b1.reshape(1, Hid)
    b2_row = b2.reshape(1, A)

    vmem = pltpu.MemorySpace.VMEM
    out = pl.pallas_call(
        cnn_agent_fused_kernel,
        out_shape=jax.ShapeDtypeStruct((N, 1, A), jnp.float32),
        grid=(N,),
        in_specs=[
            pl.BlockSpec((1, QK, HW), lambda n: (n, 0, 0), memory_space=vmem),
            pl.BlockSpec((Cout, QK), lambda n: (0, 0), memory_space=vmem),
            pl.BlockSpec((Cout, 1), lambda n: (0, 0), memory_space=vmem),
            pl.BlockSpec((F, Hid), lambda n: (0, 0), memory_space=vmem),
            pl.BlockSpec((1, Hid), lambda n: (0, 0), memory_space=vmem),
            pl.BlockSpec((Hid, A), lambda n: (0, 0), memory_space=vmem),
            pl.BlockSpec((1, A), lambda n: (0, 0), memory_space=vmem),
        ],
        out_specs=pl.BlockSpec((1, 1, A), lambda n: (n, 0, 0), memory_space=vmem),
        compiler_params=pltpu.CompilerParams(
            dimension_semantics=("parallel",)),
    )(patches_t, wc_t, bc_col, w1, b1_row, w2, b2_row)
    return out.reshape(N, A)


# -------------------------------- reference --------------------------------

def cnn_agent_reference(x_nchw, params):
    wc, bc, w1, b1, w2, b2 = (params["w_conv"], params["b_conv"],
                              params["w1"], params["b1"],
                              params["w2"], params["b2"])
    conv = jax.lax.conv_general_dilated(
        x_nchw, wc, window_strides=(1, 1), padding=((1, 1), (1, 1)),
        dimension_numbers=("NCHW", "OIHW", "NCHW"))
    conv = conv + bc.reshape(1, -1, 1, 1)
    flat = conv.reshape(x_nchw.shape[0], -1)          # torch.nn.Flatten order
    h = jax.nn.sigmoid(flat @ w1 + b1)
    return jax.nn.sigmoid(h @ w2 + b2)


# ----------------------------------- main -----------------------------------

if __name__ == "__main__":
    # CNNAgent(input_dim=16, input_channels=4, n_kernels=8, vis_rep_size=32,
    #          action_space_size=8), batch=2.
    batch, input_dim, input_channels = 2, 16, 4
    n_kernels, vis_rep_size, action_space_size = 8, 32, 8
    size_flattened = input_dim * input_dim * n_kernels

    key = jax.random.PRNGKey(0)
    kx, kwc, kbc, kw1, kb1, kw2, kb2 = jax.random.split(key, 7)

    x = jax.random.normal(kx, (batch, input_channels, input_dim, input_dim),
                          dtype=jnp.float32)

    # TODO(synk): the module applies an external `initialize_weights`; parameters
    # are synthesized deterministically here instead (host-side init, not a kernel).
    params = {
        "w_conv": 0.1 * jax.random.normal(kwc, (n_kernels, input_channels, 3, 3), jnp.float32),
        "b_conv": 0.1 * jax.random.normal(kbc, (n_kernels,), jnp.float32),
        "w1": 0.05 * jax.random.normal(kw1, (size_flattened, vis_rep_size), jnp.float32),
        "b1": 0.1 * jax.random.normal(kb1, (vis_rep_size,), jnp.float32),
        "w2": 0.1 * jax.random.normal(kw2, (vis_rep_size, action_space_size), jnp.float32),
        "b2": 0.1 * jax.random.normal(kb2, (action_space_size,), jnp.float32),
    }

    out = jax.block_until_ready(cnn_agent_forward(x, params))
    ref = cnn_agent_reference(x, params)

    assert out.shape == (batch, action_space_size), out.shape
    assert jnp.allclose(out, ref, atol=1e-4, rtol=1e-4), (
        f"max abs err = {jnp.max(jnp.abs(out - ref))}")

    print("KERNEL_OK")
</pallas_src>

<mosaic_0001>
module attributes {stable_mosaic.version = 11 : i64} {
  func.func @cnn_agent_fused_kernel(%arg0: i32, %arg1: memref<1x36x256xf32, #tpu.memory_space<vmem>>, %arg2: memref<8x36xf32, #tpu.memory_space<vmem>>, %arg3: memref<8x1xf32, #tpu.memory_space<vmem>>, %arg4: memref<2048x32xf32, #tpu.memory_space<vmem>>, %arg5: memref<1x32xf32, #tpu.memory_space<vmem>>, %arg6: memref<32x8xf32, #tpu.memory_space<vmem>>, %arg7: memref<1x8xf32, #tpu.memory_space<vmem>>, %arg8: memref<1x1x8xf32, #tpu.memory_space<vmem>>) attributes {dimension_semantics = [#tpu.dimension_semantics<parallel>], iteration_bounds = array<i64: 2>, scalar_prefetch = 0 : i64, scratch_operands = 0 : i64, tpu.core_type = #tpu.core_type<tc>, window_params = [{transform_indices = @transform_0, window_bounds = array<i64: 1, 36, 256>}, {pipeline_mode = #tpu.pipeline_mode<synchronous>, transform_indices = @transform_1, window_bounds = array<i64: 8, 36>}, {pipeline_mode = #tpu.pipeline_mode<synchronous>, transform_indices = @transform_2, window_bounds = array<i64: 8, 1>}, {pipeline_mode = #tpu.pipeline_mode<synchronous>, transform_indices = @transform_3, window_bounds = array<i64: 2048, 32>}, {pipeline_mode = #tpu.pipeline_mode<synchronous>, transform_indices = @transform_4, window_bounds = array<i64: 1, 32>}, {pipeline_mode = #tpu.pipeline_mode<synchronous>, transform_indices = @transform_5, window_bounds = array<i64: 32, 8>}, {pipeline_mode = #tpu.pipeline_mode<synchronous>, transform_indices = @transform_6, window_bounds = array<i64: 1, 8>}, {transform_indices = @transform_7, window_bounds = array<i64: 1, 1, 8>}]} {
    %c0 = arith.constant 0 : index
    %c0_0 = arith.constant 0 : index
    %c0_1 = arith.constant 0 : index
    %0 = vector.load %arg1[%c0, %c0_0, %c0_1] : memref<1x36x256xf32, #tpu.memory_space<vmem>>, vector<1x36x256xf32>
    %1 = vector.shape_cast %0 : vector<1x36x256xf32> to vector<36x256xf32>
    %c0_2 = arith.constant 0 : index
    %c0_3 = arith.constant 0 : index
    %2 = vector.load %arg2[%c0_2, %c0_3] : memref<8x36xf32, #tpu.memory_space<vmem>>, vector<8x36xf32>
    %cst = arith.constant dense<0.000000e+00> : vector<8x256xf32>
    %3 = tpu.matmul %2, %1, %cst {dimension_numbers = #tpu.dot_dimension_numbers<[1], [0], [0], [1], [0, 0, 1, 1], [], []>} : vector<8x36xf32>, vector<36x256xf32>, vector<8x256xf32> -> vector<8x256xf32>
    %c0_4 = arith.constant 0 : index
    %c0_5 = arith.constant 0 : index
    %4 = vector.load %arg3[%c0_4, %c0_5] : memref<8x1xf32, #tpu.memory_space<vmem>>, vector<8x1xf32>
    %5 = vector.broadcast %4 : vector<8x1xf32> to vector<8x256xf32>
    %6 = arith.addf %3, %5 : vector<8x256xf32>
    %7 = tpu.concatenate %6, %6, %6, %6, %6, %6, %6, %6 in 1 : vector<8x256xf32>, vector<8x256xf32>, vector<8x256xf32>, vector<8x256xf32>, vector<8x256xf32>, vector<8x256xf32>, vector<8x256xf32>, vector<8x256xf32> -> vector<8x2048xf32>
    %8 = tpu.iota {dimensions = array<i32: 0>} : vector<8x2048xi32>
    %9 = tpu.iota {dimensions = array<i32: 1>} : vector<8x2048xi32>
    %c256_i32 = arith.constant 256 : i32
    %10 = vector.broadcast %c256_i32 : i32 to vector<8x2048xi32>
    %11 = arith.muli %8, %10 : vector<8x2048xi32>
    %12 = arith.cmpi sge, %9, %11 : vector<8x2048xi32>
    %c1_i32 = arith.constant 1 : i32
    %13 = vector.broadcast %c1_i32 : i32 to vector<8x2048xi32>
    %14 = arith.addi %8, %13 : vector<8x2048xi32>
    %c256_i32_6 = arith.constant 256 : i32
    %15 = vector.broadcast %c256_i32_6 : i32 to vector<8x2048xi32>
    %16 = arith.muli %14, %15 : vector<8x2048xi32>
    %17 = arith.cmpi slt, %9, %16 : vector<8x2048xi32>
    %18 = arith.andi %12, %17 : vector<8x2048xi1>
    %cst_7 = arith.constant 0.000000e+00 : f32
    %19 = vector.broadcast %cst_7 : f32 to vector<8x2048xf32>
    %20 = arith.select %18, %7, %19 : vector<8x2048xi1>, vector<8x2048xf32>
    %c0_8 = arith.constant 0 : index
    %c0_9 = arith.constant 0 : index
    %21 = vector.load %arg4[%c0_8, %c0_9] : memref<2048x32xf32, #tpu.memory_space<vmem>>, vector<2048x32xf32>
    %cst_10 = arith.constant dense<0.000000e+00> : vector<8x32xf32>
    %22 = tpu.matmul %20, %21, %cst_10 {dimension_numbers = #tpu.dot_dimension_numbers<[1], [0], [0], [1], [0, 0, 1, 1], [], []>} : vector<8x2048xf32>, vector<2048x32xf32>, vector<8x32xf32> -> vector<8x32xf32>
    %cst_11 = arith.constant dense<0.000000e+00> : vector<32xf32>
    %23 = vector.multi_reduction <add>, %22, %cst_11 [0] : vector<8x32xf32> to vector<32xf32>
    %24 = vector.shape_cast %23 : vector<32xf32> to vector<1x32xf32>
    %c0_12 = arith.constant 0 : index
    %c0_13 = arith.constant 0 : index
    %25 = vector.load %arg5[%c0_12, %c0_13] : memref<1x32xf32, #tpu.memory_space<vmem>>, vector<1x32xf32>
    %26 = arith.addf %24, %25 : vector<1x32xf32>
    %27 = arith.negf %26 : vector<1x32xf32>
    %28 = math.exp %27 : vector<1x32xf32>
    %cst_14 = arith.constant 1.000000e+00 : f32
    %29 = vector.broadcast %cst_14 : f32 to vector<1x32xf32>
    %30 = arith.addf %29, %28 : vector<1x32xf32>
    %31 = arith.divf %29, %30 : vector<1x32xf32>
    %c0_15 = arith.constant 0 : index
    %c0_16 = arith.constant 0 : index
    %32 = vector.load %arg6[%c0_15, %c0_16] : memref<32x8xf32, #tpu.memory_space<vmem>>, vector<32x8xf32>
    %cst_17 = arith.constant dense<0.000000e+00> : vector<1x8xf32>
    %33 = tpu.matmul %31, %32, %cst_17 {dimension_numbers = #tpu.dot_dimension_numbers<[1], [0], [0], [1], [0, 0, 1, 1], [], []>} : vector<1x32xf32>, vector<32x8xf32>, vector<1x8xf32> -> vector<1x8xf32>
    %c0_18 = arith.constant 0 : index
    %c0_19 = arith.constant 0 : index
    %34 = vector.load %arg7[%c0_18, %c0_19] : memref<1x8xf32, #tpu.memory_space<vmem>>, vector<1x8xf32>
    %35 = arith.addf %33, %34 : vector<1x8xf32>
    %36 = arith.negf %35 : vector<1x8xf32>
    %37 = math.exp %36 : vector<1x8xf32>
    %cst_20 = arith.constant 1.000000e+00 : f32
    %38 = vector.broadcast %cst_20 : f32 to vector<1x8xf32>
    %39 = arith.addf %38, %37 : vector<1x8xf32>
    %40 = arith.divf %38, %39 : vector<1x8xf32>
    %c0_21 = arith.constant 0 : index
    %c0_22 = arith.constant 0 : index
    %c0_23 = arith.constant 0 : index
    %41 = vector.load %arg8[%c0_21, %c0_22, %c0_23] : memref<1x1x8xf32, #tpu.memory_space<vmem>>, vector<1x1x8xf32>
    %42 = vector.shape_cast %41 : vector<1x1x8xf32> to vector<1x8xf32>
    %43 = vector.shape_cast %40 : vector<1x8xf32> to vector<1x1x8xf32>
    tpu.vector_store %arg8[%c0_21, %c0_22, %c0_23], %43 {strides = array<i32>} : memref<1x1x8xf32, #tpu.memory_space<vmem>>, vector<1x1x8xf32>,
    return
  }
  func.func @transform_0(%arg0: i32) -> (i32, i32, i32) {
    %c0_i32 = arith.constant 0 : i32
    %c0_i32_0 = arith.constant 0 : i32
    %c0_i32_1 = arith.constant 0 : i32
    return %arg0, %c0_i32, %c0_i32_0 : i32, i32, i32
  }
  func.func @transform_1(%arg0: i32) -> (i32, i32) {
    %c0_i32 = arith.constant 0 : i32
    %c0_i32_0 = arith.constant 0 : i32
    %c0_i32_1 = arith.constant 0 : i32
    return %c0_i32, %c0_i32_0 : i32, i32
  }
  func.func @transform_2(%arg0: i32) -> (i32, i32) {
    %c0_i32 = arith.constant 0 : i32
    %c0_i32_0 = arith.constant 0 : i32
    %c0_i32_1 = arith.constant 0 : i32
    return %c0_i32, %c0_i32_0 : i32, i32
  }
  func.func @transform_3(%arg0: i32) -> (i32, i32) {
    %c0_i32 = arith.constant 0 : i32
    %c0_i32_0 = arith.constant 0 : i32
    %c0_i32_1 = arith.constant 0 : i32
    return %c0_i32, %c0_i32_0 : i32, i32
  }
  func.func @transform_4(%arg0: i32) -> (i32, i32) {
    %c0_i32 = arith.constant 0 : i32
    %c0_i32_0 = arith.constant 0 : i32
    %c0_i32_1 = arith.constant 0 : i32
    return %c0_i32, %c0_i32_0 : i32, i32
  }
  func.func @transform_5(%arg0: i32) -> (i32, i32) {
    %c0_i32 = arith.constant 0 : i32
    %c0_i32_0 = arith.constant 0 : i32
    %c0_i32_1 = arith.constant 0 : i32
    return %c0_i32, %c0_i32_0 : i32, i32
  }
  func.func @transform_6(%arg0: i32) -> (i32, i32) {
    %c0_i32 = arith.constant 0 : i32
    %c0_i32_0 = arith.constant 0 : i32
    %c0_i32_1 = arith.constant 0 : i32
    return %c0_i32, %c0_i32_0 : i32, i32
  }
  func.func @transform_7(%arg0: i32) -> (i32, i32, i32) {
    %c0_i32 = arith.constant 0 : i32
    %c0_i32_0 = arith.constant 0 : i32
    %c0_i32_1 = arith.constant 0 : i32
    return %arg0, %c0_i32, %c0_i32_0 : i32, i32, i32
  }
}

</mosaic_0001>

<bundles_post_ra>
// kernel: cnn_agent_forward.1
= control target key start
LH: loop header
LB: loop body
LE: loop exit
PB: predicated region body
PF: predicated region fallthrough
CT: control target
= control target key end

     0   :  { %12 = vsyncpa [#allocation3], 0  ;;  %s2345_s0 = inlined_call_operand.vmem [shape: f32[2,36,256], index: 0, kind: input, shape index: {}]   ;;  %s2346_s1 = inlined_call_operand.vmem [shape: f32[8,36], index: 1, kind: input, shape index: {}]   ;;  %s2347_s2 = inlined_call_operand.vmem [shape: f32[8,1], index: 2, kind: input, shape index: {}]   ;;  %s2348_s3 = inlined_call_operand.vmem [shape: f32[2048,32], index: 3, kind: input, shape index: {}]   ;;  %s2349_s4 = inlined_call_operand.vmem [shape: f32[1,32], index: 4, kind: input, shape index: {}]   ;;  %s2350_s5 = inlined_call_operand.vmem [shape: f32[32,8], index: 5, kind: input, shape index: {}]   ;;  %s2351_s6 = inlined_call_operand.vmem [shape: f32[1,8], index: 6, kind: input, shape index: {}]   ;;  %s2352_s7 = inlined_call_operand.hbm [shape: f32[2,1,8], index: 7, kind: output, shape index: {}]  }
   0x1   :  { %14 = vsyncpa [#allocation3 + $0x1], 0  ;;  %s1337_s24 = smov 0   ;;  %s1339_s25 = smov 0  }
   0x2   :  { %s1341_s26 = smov 0   ;;  %s1343_s27 = smov 0  }
   0x3 LB: > { %s1358_s28 = sadd.s32 4294967295, %s1294_s27   ;;  %s1152_s29 = sadd.s32 4294967294, %s1294_s27   ;;  %s1294_s27 = sphi %s1343_s27, %s2364_s27   ;;  %s1290_s26 = sphi %s1341_s26, %s2363_s26   ;;  %s1286_s25 = sphi %s1339_s25, %s2362_s25   ;;  %s1282_s24 = sphi %s1337_s24, %s2361_s24  }
   0x4   : > { %s1362_s30 = sadd.s32 1, %s1294_s27   ;;  %s179_s8 = sadd.s32 1, %s1290_s26 }
   0x5   : > { %s176_s9 = ssub.s32 %s1294_s27, %s1362_s30  ;;  %p189_p0 = scmp.ne.s32.totalorder %s1290_s26, %s1286_s25 }
   0x6   : > { %p177_p1 = scmp.eq.s32.totalorder %s176_s9, 0  ;;  %p190_p2 = scmp.eq.s32.totalorder %s1358_s28, 1 }
   0x7   : > { %p195_p3 = scmp.ne.s32.totalorder %s1286_s25, %s1282_s24  ;;  %p196_p4 = scmp.eq.s32.totalorder %s1152_s29, 1 }
   0x8   : > { %s1373_s10 = scalar_select %p177_p1, %s1290_s26, %s179_s8  }
   0x9   : > { %p1375_p5 = por %p190_p2, %p189_p0  ;;  %p1379_p6 = por %p196_p4, %p195_p3 }
   0xa   : > { %p1155_p7 = scmp.ge.s32.totalorder %s1294_s27, 1  ;;  %p240_p8 = scmp.lt.s32.totalorder %s1294_s27, 3 }
   0xc   : > { %p241_p9 = pnand %p1155_p7, %p240_p8 }
   0xd   : > { %p271_p10 = scmp.lt.s32.totalorder (!%p241_p9), %s1358_s28, 1  ;;  %s269_s14 = sand.u32 (!%p241_p9), 1, %s1286_s25  }
   0xe   : > { %244 = sbr.rel (%p241_p9) target bundleno = 580 (0x244), region = 48  ;;  %s1093_s18 = scalar_lea.hbm (!%p241_p9), %s2352_s7, %s1358_s28 }
   0xf   : > { %s270_s20 = scalar_lea.vmem (!%p241_p9), [#allocation2], %s269_s14  ;;  %s1097_s22 = sshll.u32 (!%p241_p9), %s1093_s18, 4  ;;  %s1098_s22 = int_to_ptr.hbm [resolvable:$true] %s1097_s22 }
  0x10   : > { %s1095_s21 = sshll.u32 (!%p241_p9), %s270_s20, 4  ;;  %s1096_s21 = int_to_ptr.vmem [resolvable:$true] %s1095_s21 }
  0x13   : > { %v287_v0 = vld [vmem:[%s2347_s2] sm:$0xff]  ;;  %v1296_v1 = vmov 0   ;;  %v445_v2 = vld [vmem:[%s2348_s3 + $0x78] sm:$0xff]  ;;  %s272_s19 = scalar_select %p271_p10, %s1358_s28, 1  ;;  %v444_v4 = vld [vmem:[%s2348_s3 + $0x70] sm:$0xff]  ;;  %vm297_vm0 = vcmask 1043456  }
  0x14   : > { %1223 = vset.pattern.permute.xlu0 %v1296_v1  ;;  %v461_v3 = vld [vmem:[%s2348_s3 + $0xf8] sm:$0xff]  ;;  %686 = vmatpush.msra.mxu2 %v445_v2  ;;  %v460_v5 = vld [vmem:[%s2348_s3 + $0xf0] sm:$0xff]  ;;  %v443_v6 = vld [vmem:[%s2348_s3 + $0x68] sm:$0xff]  ;;  %vm293_vm1 = vcmask 293888   ;;  %s1085_s28 = scalar_lea.sflag [#allocation3], %s269_s14 }
  0x15   : > { %290 = vperm.xlu0 %1223, %v287_v0   ;;  %706 = vmatpush.msra.mxu3 %v461_v3  ;;  %s1182_s9 = smul.u32 80, %s272_s19  ;;  %v459_v7 = vld [vmem:[%s2348_s3 + $0xe8] sm:$0xff]  ;;  %v442_v8 = vld [vmem:[%s2348_s3 + $0x60] sm:$0xff]  ;;  %v441_v14 = vld [vmem:[%s2348_s3 + $0x58] sm:$0xff]  ;;  %s1246_s19 = sshra.s32 %s1098_s22, 4  ;;  %s1247_s19 = int_to_ptr.hbm [resolvable:$true] %s1246_s19 }
  0x16   : > { %687 = vmatpush.msra.mxu2 %v444_v4  ;;  %v458_v9 = vld [vmem:[%s2348_s3 + $0xe0] sm:$0xff]  ;;  %v457_v15 = vld [vmem:[%s2348_s3 + $0xd8] sm:$0xff]  ;;  %v440_v20 = vld [vmem:[%s2348_s3 + $0x50] sm:$0xff]  ;;  %s1248_s23 = scalar_lea.hbm %s1247_s19, 1  ;;  %p1253_p0 = scmp.lt.s32.totalorder %s1247_s19, %s2352_s7 }
  0x17   : > { %707 = vmatpush.msra.mxu3 %v460_v5  ;;  %s275_s17 = scalar_lea.vmem %s2345_s0, %s1182_s9  ;;  %v456_v21 = vld [vmem:[%s2348_s3 + $0xd0] sm:$0xff]  ;;  %v439_v22 = vld [vmem:[%s2348_s3 + $0x48] sm:$0xff]  ;;  %v286_v26 = vld [vmem:[%s2346_s1] sm:$0xff]  ;;  %p1249_p11 = scmp.ne.s32.totalorder %s1247_s19, %s1248_s23 }
  0x18   : > { %688 = vmatpush.msra.mxu2 %v443_v6  ;;  %v284_v10 = vld [vmem:[%s275_s17 + $0x40] sm:$0xf]  ;;  %v285_v11 = vld [vmem:[%s275_s17 + $0x48] sm:$0xf]  ;;  %v282_v12 = vld [vmem:[%s275_s17 + $0x30] sm:$0xff]  ;;  %s1252_s9 = scalar_lea.hbm %s2352_s7, 2 }
  0x19   : > { %708 = vmatpush.msra.mxu3 %v459_v7  ;;  %1157 = vmatpush.msk.msra.mxu0 %vm297_vm0, %v284_v10  ;;  %v283_v13 = vld [vmem:[%s275_s17 + $0x38] sm:$0xff]  ;;  %v280_v16 = vld [vmem:[%s275_s17 + $0x20] sm:$0xff]  ;;  %v281_v17 = vld [vmem:[%s275_s17 + $0x28] sm:$0xff]  ;;  %p1250_p12 = pnand %p1249_p11, %p1375_p5  ;;  %p1254_p1 = scmp.lt.s32.totalorder %s1252_s9, %s1248_s23 }
  0x1a   : > { %1159 = vmatpush.msk.msra.mxu1 %vm297_vm0, %v285_v11  ;;  %689 = vmatpush.msra.mxu2 %v442_v8  ;;  %v278_v18 = vld [vmem:[%s275_s17 + $0x10] sm:$0xff]  ;;  %v279_v19 = vld [vmem:[%s275_s17 + $0x18] sm:$0xff]  ;;  %v455_v23 = vld [vmem:[%s2348_s3 + $0xc8] sm:$0xff] }
  0x1b   : > { %709 = vmatpush.msra.mxu3 %v458_v9  ;;  %316 = vmatpush.msra.mxu0 %v282_v12  ;;  %v276_v24 = vld [vmem:[%s275_s17] sm:$0xff]  ;;  %v277_v25 = vld [vmem:[%s275_s17 + $0x8] sm:$0xff]  ;;  %v477_v27 = vld [vmem:[%s2348_s3 + $0x178] sm:$0xff]  ;;  %p1251_p13 = pneg %p1250_p12  ;;  %p1255_p2 = por %p1254_p1, %p1253_p0 }
  0x1c   : > { %336 = vmatpush.msra.mxu1 %v283_v13  ;;  %690 = vmatpush.msra.mxu2 %v441_v14  ;;  %v493_v28 = vld [vmem:[%s2348_s3 + $0x1f8] sm:$0xff]  ;;  %v438_v29 = vld [vmem:[%s2348_s3 + $0x40] sm:$0xff]  ;;  %v476_v31 = vld [vmem:[%s2348_s3 + $0x170] sm:$0xff] }
  0x1d   : > { %710 = vmatpush.msra.mxu3 %v457_v15  ;;  %317 = vmatpush.msra.mxu0 %v280_v16  ;;  %v454_v30 = vld [vmem:[%s2348_s3 + $0xc0] sm:$0xff]  ;;  %v492_v32 = vld [vmem:[%s2348_s3 + $0x1f0] sm:$0xff]  ;;  %v437_v33 = vld [vmem:[%s2348_s3 + $0x38] sm:$0xff]  ;;  %p1256_p3 = pnand %p1255_p2, %p1251_p13 }
  0x1e   : > { %337 = vmatpush.msra.mxu1 %v281_v17  ;;  %691 = vmatpush.msra.mxu2 %v440_v20  ;;  %v453_v34 = vld [vmem:[%s2348_s3 + $0xb8] sm:$0xff]  ;;  %v475_v35 = vld [vmem:[%s2348_s3 + $0x168] sm:$0xff]  ;;  %v436_v37 = vld [vmem:[%s2348_s3 + $0x30] sm:$0xff] }
  0x1f   : > { %711 = vmatpush.msra.mxu3 %v456_v21  ;;  %318 = vmatpush.msra.mxu0 %v278_v18  ;;  %v491_v36 = vld [vmem:[%s2348_s3 + $0x1e8] sm:$0xff]  ;;  %v452_v38 = vld [vmem:[%s2348_s3 + $0xb0] sm:$0xff]  ;;  %v474_v39 = vld [vmem:[%s2348_s3 + $0x160] sm:$0xff] }
  0x20   : > { %338 = vmatpush.msra.mxu1 %v279_v19  ;;  %692 = vmatpush.msra.mxu2 %v439_v22  ;;  %v490_v40 = vld [vmem:[%s2348_s3 + $0x1e0] sm:$0xff]  ;;  %v435_v41 = vld [vmem:[%s2348_s3 + $0x28] sm:$0xff]  ;;  %v473_v43 = vld [vmem:[%s2348_s3 + $0x158] sm:$0xff] }
  0x21   : > { %712 = vmatpush.msra.mxu3 %v455_v23  ;;  %319 = vmatpush.msra.mxu0 %v276_v24  ;;  %v451_v42 = vld [vmem:[%s2348_s3 + $0xa8] sm:$0xff]  ;;  %v489_v44 = vld [vmem:[%s2348_s3 + $0x1d8] sm:$0xff]  ;;  %v434_v45 = vld [vmem:[%s2348_s3 + $0x20] sm:$0xff] }
  0x22   : > { %339 = vmatpush.msra.mxu1 %v277_v25  ;;  %1158 = vmatmul.msk.f32.vlgmr.msra.gmra.mxu0 %vm293_vm1, %v286_v26  ;;  %v450_v46 = vld [vmem:[%s2348_s3 + $0xa0] sm:$0xff]  ;;  %v472_v47 = vld [vmem:[%s2348_s3 + $0x150] sm:$0xff]  ;;  %v433_v49 = vld [vmem:[%s2348_s3 + $0x18] sm:$0xff] }
  0x23   : > { %1160 = vmatmul.msk.f32.vlgmr.msra.gmra.mxu1 %vm293_vm1, %v286_v26  ;;  %726 = vmatpush.msrb.mxu0 %v477_v27  ;;  %v488_v48 = vld [vmem:[%s2348_s3 + $0x1d0] sm:$0xff]  ;;  %v449_v50 = vld [vmem:[%s2348_s3 + $0x98] sm:$0xff]  ;;  %v471_v51 = vld [vmem:[%s2348_s3 + $0x148] sm:$0xff] }
  0x24   : > { %746 = vmatpush.msrb.mxu1 %v493_v28  ;;  %693 = vmatpush.msra.mxu2 %v438_v29  ;;  %v487_v52 = vld [vmem:[%s2348_s3 + $0x1c8] sm:$0xff]  ;;  %v432_v53 = vld [vmem:[%s2348_s3 + $0x10] sm:$0xff]  ;;  %v470_v55 = vld [vmem:[%s2348_s3 + $0x140] sm:$0xff] }
  0x25   : > { %713 = vmatpush.msra.mxu3 %v454_v30  ;;  %727 = vmatpush.msrb.mxu0 %v476_v31  ;;  %v448_v54 = vld [vmem:[%s2348_s3 + $0x90] sm:$0xff]  ;;  %v486_v56 = vld [vmem:[%s2348_s3 + $0x1c0] sm:$0xff]  ;;  %v431_v57 = vld [vmem:[%s2348_s3 + $0x8] sm:$0xff] }
  0x26   : > { %747 = vmatpush.msrb.mxu1 %v492_v32  ;;  %694 = vmatpush.msra.mxu2 %v437_v33  ;;  %v447_v58 = vld [vmem:[%s2348_s3 + $0x88] sm:$0xff]  ;;  %v469_v59 = vld [vmem:[%s2348_s3 + $0x138] sm:$0xff]  ;;  %v430_v61 = vld [vmem:[%s2348_s3] sm:$0xff] }
  0x27   : > { %714 = vmatpush.msra.mxu3 %v453_v34  ;;  %728 = vmatpush.msrb.mxu0 %v475_v35  ;;  %v485_v60 = vld [vmem:[%s2348_s3 + $0x1b8] sm:$0xff]  ;;  %v446_v62 = vld [vmem:[%s2348_s3 + $0x80] sm:$0xff]  ;;  %v468_v63 = vld [vmem:[%s2348_s3 + $0x130] sm:$0xff] }
  0x28   : > { %748 = vmatpush.msrb.mxu1 %v491_v36  ;;  %695 = vmatpush.msra.mxu2 %v436_v37  ;;  %v484_v0 = vld [vmem:[%s2348_s3 + $0x1b0] sm:$0xff]  ;;  %v509_v1 = vld [vmem:[%s2348_s3 + $0x278] sm:$0xff]  ;;  %v467_v3 = vld [vmem:[%s2348_s3 + $0x128] sm:$0xff] }
  0x29   : > { %715 = vmatpush.msra.mxu3 %v452_v38  ;;  %729 = vmatpush.msrb.mxu0 %v474_v39  ;;  %v525_v2 = vld [vmem:[%s2348_s3 + $0x2f8] sm:$0xff]  ;;  %v483_v4 = vld [vmem:[%s2348_s3 + $0x1a8] sm:$0xff]  ;;  %v508_v5 = vld [vmem:[%s2348_s3 + $0x270] sm:$0xff] }
  0x2a   : > { %749 = vmatpush.msrb.mxu1 %v490_v40  ;;  %696 = vmatpush.msra.mxu2 %v435_v41  ;;  %v524_v6 = vld [vmem:[%s2348_s3 + $0x2f0] sm:$0xff]  ;;  %v466_v7 = vld [vmem:[%s2348_s3 + $0x120] sm:$0xff]  ;;  %v507_v9 = vld [vmem:[%s2348_s3 + $0x268] sm:$0xff] }
  0x2b   : > { %716 = vmatpush.msra.mxu3 %v451_v42  ;;  %730 = vmatpush.msrb.mxu0 %v473_v43  ;;  %v482_v8 = vld [vmem:[%s2348_s3 + $0x1a0] sm:$0xff]  ;;  %v523_v10 = vld [vmem:[%s2348_s3 + $0x2e8] sm:$0xff]  ;;  %v465_v11 = vld [vmem:[%s2348_s3 + $0x118] sm:$0xff] }
  0x2c   : > { %750 = vmatpush.msrb.mxu1 %v489_v44  ;;  %697 = vmatpush.msra.mxu2 %v434_v45  ;;  %v481_v12 = vld [vmem:[%s2348_s3 + $0x198] sm:$0xff]  ;;  %v506_v13 = vld [vmem:[%s2348_s3 + $0x260] sm:$0xff]  ;;  %v464_v15 = vld [vmem:[%s2348_s3 + $0x110] sm:$0xff] }
  0x2d   : > { %717 = vmatpush.msra.mxu3 %v450_v46  ;;  %731 = vmatpush.msrb.mxu0 %v472_v47  ;;  %v522_v14 = vld [vmem:[%s2348_s3 + $0x2e0] sm:$0xff]  ;;  %v480_v16 = vld [vmem:[%s2348_s3 + $0x190] sm:$0xff]  ;;  %v505_v17 = vld [vmem:[%s2348_s3 + $0x258] sm:$0xff] }
  0x2e   : > { %751 = vmatpush.msrb.mxu1 %v488_v48  ;;  %698 = vmatpush.msra.mxu2 %v433_v49  ;;  %v521_v18 = vld [vmem:[%s2348_s3 + $0x2d8] sm:$0xff]  ;;  %v463_v19 = vld [vmem:[%s2348_s3 + $0x108] sm:$0xff]  ;;  %v504_v21 = vld [vmem:[%s2348_s3 + $0x250] sm:$0xff] }
  0x2f   : > { %718 = vmatpush.msra.mxu3 %v449_v50  ;;  %732 = vmatpush.msrb.mxu0 %v471_v51  ;;  %v479_v20 = vld [vmem:[%s2348_s3 + $0x188] sm:$0xff]  ;;  %v520_v22 = vld [vmem:[%s2348_s3 + $0x2d0] sm:$0xff]  ;;  %v462_v23 = vld [vmem:[%s2348_s3 + $0x100] sm:$0xff] }
  0x30   : > { %752 = vmatpush.msrb.mxu1 %v487_v52  ;;  %699 = vmatpush.msra.mxu2 %v432_v53  ;;  %v478_v24 = vld [vmem:[%s2348_s3 + $0x180] sm:$0xff]  ;;  %v541_v25 = vld [vmem:[%s2348_s3 + $0x378] sm:$0xff]  ;;  %v503_v27 = vld [vmem:[%s2348_s3 + $0x248] sm:$0xff] }
  0x31   : > { %719 = vmatpush.msra.mxu3 %v448_v54  ;;  %733 = vmatpush.msrb.mxu0 %v470_v55  ;;  %v557_v26 = vld [vmem:[%s2348_s3 + $0x3f8] sm:$0xff]  ;;  %v519_v28 = vld [vmem:[%s2348_s3 + $0x2c8] sm:$0xff]  ;;  %v540_v29 = vld [vmem:[%s2348_s3 + $0x370] sm:$0xff] }
  0x32   : > { %753 = vmatpush.msrb.mxu1 %v486_v56  ;;  %700 = vmatpush.msra.mxu2 %v431_v57  ;;  %v556_v30 = vld [vmem:[%s2348_s3 + $0x3f0] sm:$0xff]  ;;  %v502_v31 = vld [vmem:[%s2348_s3 + $0x240] sm:$0xff]  ;;  %v539_v33 = vld [vmem:[%s2348_s3 + $0x368] sm:$0xff] }
  0x33   : > { %720 = vmatpush.msra.mxu3 %v447_v58  ;;  %734 = vmatpush.msrb.mxu0 %v469_v59  ;;  %v518_v32 = vld [vmem:[%s2348_s3 + $0x2c0] sm:$0xff]  ;;  %v555_v34 = vld [vmem:[%s2348_s3 + $0x3e8] sm:$0xff]  ;;  %v501_v35 = vld [vmem:[%s2348_s3 + $0x238] sm:$0xff] }
  0x34   : > { %754 = vmatpush.msrb.mxu1 %v485_v60  ;;  %701 = vmatpush.msra.mxu2 %v430_v61  ;;  %v517_v36 = vld [vmem:[%s2348_s3 + $0x2b8] sm:$0xff]  ;;  %v538_v37 = vld [vmem:[%s2348_s3 + $0x360] sm:$0xff]  ;;  %v500_v39 = vld [vmem:[%s2348_s3 + $0x230] sm:$0xff] }
  0x35   : > { %721 = vmatpush.msra.mxu3 %v446_v62  ;;  %735 = vmatpush.msrb.mxu0 %v468_v63  ;;  %v554_v38 = vld [vmem:[%s2348_s3 + $0x3e0] sm:$0xff]  ;;  %v516_v40 = vld [vmem:[%s2348_s3 + $0x2b0] sm:$0xff]  ;;  %v537_v41 = vld [vmem:[%s2348_s3 + $0x358] sm:$0xff] }
  0x36   : > { %755 = vmatpush.msrb.mxu1 %v484_v0  ;;  %766 = vmatpush.msrb.mxu2 %v509_v1  ;;  %v553_v42 = vld [vmem:[%s2348_s3 + $0x3d8] sm:$0xff]  ;;  %v499_v43 = vld [vmem:[%s2348_s3 + $0x228] sm:$0xff]  ;;  %v536_v45 = vld [vmem:[%s2348_s3 + $0x350] sm:$0xff] }
  0x37   : > { %786 = vmatpush.msrb.mxu3 %v525_v2  ;;  %736 = vmatpush.msrb.mxu0 %v467_v3  ;;  %v515_v44 = vld [vmem:[%s2348_s3 + $0x2a8] sm:$0xff]  ;;  %v552_v46 = vld [vmem:[%s2348_s3 + $0x3d0] sm:$0xff]  ;;  %v498_v47 = vld [vmem:[%s2348_s3 + $0x220] sm:$0xff] }
  0x38   : > { %756 = vmatpush.msrb.mxu1 %v483_v4  ;;  %767 = vmatpush.msrb.mxu2 %v508_v5  ;;  %v514_v48 = vld [vmem:[%s2348_s3 + $0x2a0] sm:$0xff]  ;;  %v535_v49 = vld [vmem:[%s2348_s3 + $0x348] sm:$0xff]  ;;  %v497_v51 = vld [vmem:[%s2348_s3 + $0x218] sm:$0xff] }
  0x39   : > { %787 = vmatpush.msrb.mxu3 %v524_v6  ;;  %737 = vmatpush.msrb.mxu0 %v466_v7  ;;  %v551_v50 = vld [vmem:[%s2348_s3 + $0x3c8] sm:$0xff]  ;;  %v513_v52 = vld [vmem:[%s2348_s3 + $0x298] sm:$0xff]  ;;  %v534_v53 = vld [vmem:[%s2348_s3 + $0x340] sm:$0xff] }
  0x3a   : > { %757 = vmatpush.msrb.mxu1 %v482_v8  ;;  %768 = vmatpush.msrb.mxu2 %v507_v9  ;;  %v550_v54 = vld [vmem:[%s2348_s3 + $0x3c0] sm:$0xff]  ;;  %v496_v55 = vld [vmem:[%s2348_s3 + $0x210] sm:$0xff]  ;;  %v533_v57 = vld [vmem:[%s2348_s3 + $0x338] sm:$0xff] }
  0x3b   : > { %788 = vmatpush.msrb.mxu3 %v523_v10  ;;  %738 = vmatpush.msrb.mxu0 %v465_v11  ;;  %v512_v56 = vld [vmem:[%s2348_s3 + $0x290] sm:$0xff]  ;;  %v549_v58 = vld [vmem:[%s2348_s3 + $0x3b8] sm:$0xff]  ;;  %v495_v59 = vld [vmem:[%s2348_s3 + $0x208] sm:$0xff] }
  0x3c   : > { %758 = vmatpush.msrb.mxu1 %v481_v12  ;;  %769 = vmatpush.msrb.mxu2 %v506_v13  ;;  %v511_v60 = vld [vmem:[%s2348_s3 + $0x288] sm:$0xff]  ;;  %v532_v61 = vld [vmem:[%s2348_s3 + $0x330] sm:$0xff]  ;;  %v530_v1 = vld [vmem:[%s2348_s3 + $0x320] sm:$0xff]  ;;  %v344_v13 = vlaneseq }
  0x3d   : > { %789 = vmatpush.msrb.mxu3 %v522_v14  ;;  %739 = vmatpush.msrb.mxu0 %v464_v15  ;;  %v548_v62 = vld [vmem:[%s2348_s3 + $0x3b0] sm:$0xff]  ;;  %v531_v63 = vld [vmem:[%s2348_s3 + $0x328] sm:$0xff]  ;;  %v546_v2 = vld [vmem:[%s2348_s3 + $0x3a0] sm:$0xff] }
  0x3e   : > { %759 = vmatpush.msrb.mxu1 %v480_v16  ;;  %770 = vmatpush.msrb.mxu2 %v505_v17  ;;  %v547_v0 = vld [vmem:[%s2348_s3 + $0x3a8] sm:$0xff]  ;;  %v529_v3 = vld [vmem:[%s2348_s3 + $0x318] sm:$0xff]  ;;  %v528_v5 = vld [vmem:[%s2348_s3 + $0x310] sm:$0xff]  ;;  %v345_v14 = vshrl.u32 %v344_v13, 7  ;;  %v1780_v16 = vand.u32 127, %v344_v13 }
  0x3f   : > { %790 = vmatpush.msrb.mxu3 %v521_v18  ;;  %740 = vmatpush.msrb.mxu0 %v463_v19  ;;  %v545_v4 = vld [vmem:[%s2348_s3 + $0x398] sm:$0xff]  ;;  %v544_v6 = vld [vmem:[%s2348_s3 + $0x390] sm:$0xff]  ;;  %v527_v7 = vld [vmem:[%s2348_s3 + $0x308] sm:$0xff] }
  0x40   : > { %760 = vmatpush.msrb.mxu1 %v479_v20  ;;  %771 = vmatpush.msrb.mxu2 %v504_v21  ;;  %v543_v8 = vld [vmem:[%s2348_s3 + $0x388] sm:$0xff]  ;;  %v494_v9 = vld [vmem:[%s2348_s3 + $0x200] sm:$0xff]  ;;  %v380_v15 = vadd.s32 1, %v345_v14  ;;  %v1782_v17 = vmul.u32 256, %v345_v14  ;;  %v348_v19 = vadd.s32 128, %v1780_v16  ;;  %v349_v20 = vadd.s32 256, %v1780_v16 }
  0x41   : > { %791 = vmatpush.msrb.mxu3 %v520_v22  ;;  %741 = vmatpush.msrb.mxu0 %v462_v23  ;;  %v510_v10 = vld [vmem:[%s2348_s3 + $0x280] sm:$0xff]  ;;  %v350_v21 = vadd.s32 384, %v1780_v16 }
  0x42   : > { %761 = vmatpush.msrb.mxu1 %v478_v24  ;;  %772 = vmatpush.msrb.mxu2 %v503_v27  ;;  %v526_v11 = vld [vmem:[%s2348_s3 + $0x300] sm:$0xff]  ;;  %v1784_v18 = vmul.u32 256, %v380_v15  ;;  %vm364_vm2 = vcmp.ge.s32.totalorder %v1780_v16, %v1782_v17  ;;  %vm365_vm4 = vcmp.ge.s32.totalorder %v348_v19, %v1782_v17  ;;  %vm366_vm6 = vcmp.ge.s32.totalorder %v349_v20, %v1782_v17 }
  0x43   : > { %806 = vmatpush.msra.mxu0 %v541_v25  ;;  %792 = vmatpush.msrb.mxu3 %v519_v28  ;;  %v542_v12 = vld [vmem:[%s2348_s3 + $0x380] sm:$0xff]  ;;  %vm367_vm9 = vcmp.ge.s32.totalorder %v350_v21, %v1782_v17  ;;  %v351_v27 = vadd.s32 512, %v1780_v16  ;;  %v573_v28 = vld [vmem:[%s2348_s3 + $0x478] sm:$0xff] }
  0x44   : > { %826 = vmatpush.msra.mxu1 %v557_v26  ;;  %773 = vmatpush.msrb.mxu2 %v502_v31  ;;  %vm382_vm3 = vcmp.lt.s32.totalorder %v1780_v16, %v1784_v18  ;;  %vm383_vm5 = vcmp.lt.s32.totalorder %v348_v19, %v1784_v18  ;;  %vm384_vm7 = vcmp.lt.s32.totalorder %v349_v20, %v1784_v18  ;;  %v605_v31 = vld [vmem:[%s2348_s3 + $0x578] sm:$0xff]  ;;  %v578_v13 = vld [vmem:[%s2348_s3 + $0x4a0] sm:$0xff]  ;;  %v355_v19 = vadd.s32 1024, %v1780_v16 }
  0x45   : > { %807 = vmatpush.msra.mxu0 %v540_v29  ;;  %793 = vmatpush.msrb.mxu3 %v518_v32  ;;  %vm398_vm8 = vmand %vm364_vm2, %vm382_vm3  ;;  %vm385_vm10 = vcmp.lt.s32.totalorder %v350_v21, %v1784_v18  ;;  %v589_v29 = vld [vmem:[%s2348_s3 + $0x4f8] sm:$0xff]  ;;  %vm368_vm14 = vcmp.ge.s32.totalorder %v351_v27, %v1782_v17  ;;  %vm386_vm15 = vcmp.lt.s32.totalorder %v351_v27, %v1784_v18  ;;  %v594_v14 = vld [vmem:[%s2348_s3 + $0x520] sm:$0xff]  ;;  %v357_v27 = vadd.s32 1280, %v1780_v16 }
  0x46   : > { %827 = vmatpush.msra.mxu1 %v556_v30  ;;  %774 = vmatpush.msrb.mxu2 %v501_v35  ;;  %vm399_vm11 = vmand %vm365_vm4, %vm383_vm5  ;;  %v352_v30 = vadd.s32 640, %v1780_v16  ;;  %v621_v32 = vld [vmem:[%s2348_s3 + $0x5f8] sm:$0xff]  ;;  %v588_v35 = vld [vmem:[%s2348_s3 + $0x4f0] sm:$0xff] }
  0x47   : > { %808 = vmatpush.msra.mxu0 %v539_v33  ;;  %794 = vmatpush.msrb.mxu3 %v517_v36  ;;  %vm400_vm12 = vmand %vm366_vm6, %vm384_vm7  ;;  %v353_v33 = vadd.s32 768, %v1780_v16  ;;  %v354_v36 = vadd.s32 896, %v1780_v16  ;;  %v610_v15 = vld [vmem:[%s2348_s3 + $0x5a0] sm:$0xff]  ;;  %v561_v20 = vld [vmem:[%s2348_s3 + $0x418] sm:$0xff] }
  0x48   : > { %828 = vmatpush.msra.mxu1 %v555_v34  ;;  %775 = vmatpush.msrb.mxu2 %v500_v39  ;;  %vm401_vm13 = vmand %vm367_vm9, %vm385_vm10  ;;  %v572_v34 = vld [vmem:[%s2348_s3 + $0x470] sm:$0xff]  ;;  %v571_v39 = vld [vmem:[%s2348_s3 + $0x468] sm:$0xff]  ;;  %vm369_vm0 = vcmp.ge.s32.totalorder %v352_v30, %v1782_v17  ;;  %vm387_vm1 = vcmp.lt.s32.totalorder %v352_v30, %v1784_v18  ;;  %v358_v30 = vadd.s32 1408, %v1780_v16  ;;  %vm372_vm10 = vcmp.ge.s32.totalorder %v355_v19, %v1782_v17 }
  0x49   : > { %809 = vmatpush.msra.mxu0 %v538_v37  ;;  %795 = vmatpush.msrb.mxu3 %v516_v40  ;;  %v604_v37 = vld [vmem:[%s2348_s3 + $0x570] sm:$0xff]  ;;  %v587_v40 = vld [vmem:[%s2348_s3 + $0x4e8] sm:$0xff]  ;;  %vm370_vm2 = vcmp.ge.s32.totalorder %v353_v33, %v1782_v17  ;;  %vm388_vm3 = vcmp.lt.s32.totalorder %v353_v33, %v1784_v18  ;;  %vm1863_vm4 = vmand %vm368_vm14, %vm386_vm15  ;;  %vm371_vm5 = vcmp.ge.s32.totalorder %v354_v36, %v1782_v17 }
  0x4a   : > { %829 = vmatpush.msra.mxu1 %v554_v38  ;;  %776 = vmatpush.msrb.mxu2 %v499_v43  ;;  %v620_v38 = vld [vmem:[%s2348_s3 + $0x5f0] sm:$0xff]  ;;  %v570_v43 = vld [vmem:[%s2348_s3 + $0x460] sm:$0xff]  ;;  %vm389_vm6 = vcmp.lt.s32.totalorder %v354_v36, %v1784_v18  ;;  %vm403_vm7 = vmand %vm369_vm0, %vm387_vm1  ;;  %vm374_vm14 = vcmp.ge.s32.totalorder %v357_v27, %v1782_v17  ;;  %vm392_vm15 = vcmp.lt.s32.totalorder %v357_v27, %v1784_v18 }
  0x4b   : > { %810 = vmatpush.msra.mxu0 %v537_v41  ;;  %796 = vmatpush.msrb.mxu3 %v515_v44  ;;  %v603_v41 = vld [vmem:[%s2348_s3 + $0x568] sm:$0xff]  ;;  %v586_v44 = vld [vmem:[%s2348_s3 + $0x4e0] sm:$0xff]  ;;  %vm405_vm9 = vmand %vm371_vm5, %vm389_vm6  ;;  %vm375_vm1 = vcmp.ge.s32.totalorder %v358_v30, %v1782_v17 }
  0x4c   : > { %830 = vmatpush.msra.mxu1 %v553_v42  ;;  %777 = vmatpush.msrb.mxu2 %v498_v47  ;;  %v619_v42 = vld [vmem:[%s2348_s3 + $0x5e8] sm:$0xff]  ;;  %v618_v47 = vld [vmem:[%s2348_s3 + $0x5e0] sm:$0xff]  ;;  %v577_v21 = vld [vmem:[%s2348_s3 + $0x498] sm:$0xff] }
  0x4d   : > { %811 = vmatpush.msra.mxu0 %v536_v45  ;;  %797 = vmatpush.msrb.mxu3 %v514_v48  ;;  %v569_v48 = vld [vmem:[%s2348_s3 + $0x458] sm:$0xff]  ;;  %v559_v33 = vld [vmem:[%s2348_s3 + $0x408] sm:$0xff]  ;;  %v626_v27 = vld [vmem:[%s2348_s3 + $0x620] sm:$0xff] }
  0x4e   : > { %831 = vmatpush.msra.mxu1 %v552_v46  ;;  %778 = vmatpush.msrb.mxu2 %v497_v51  ;;  %v602_v46 = vld [vmem:[%s2348_s3 + $0x560] sm:$0xff]  ;;  %v617_v51 = vld [vmem:[%s2348_s3 + $0x5d8] sm:$0xff]  ;;  %v607_v36 = vld [vmem:[%s2348_s3 + $0x588] sm:$0xff] }
  0x4f   : > { %812 = vmatpush.msra.mxu0 %v535_v49  ;;  %798 = vmatpush.msrb.mxu3 %v513_v52  ;;  %v585_v49 = vld [vmem:[%s2348_s3 + $0x4d8] sm:$0xff]  ;;  %v568_v52 = vld [vmem:[%s2348_s3 + $0x450] sm:$0xff] }
  0x50   : > { %832 = vmatpush.msra.mxu1 %v551_v50  ;;  %779 = vmatpush.msrb.mxu2 %v496_v55  ;;  %v601_v50 = vld [vmem:[%s2348_s3 + $0x558] sm:$0xff]  ;;  %v616_v55 = vld [vmem:[%s2348_s3 + $0x5d0] sm:$0xff] }
  0x51   : > { %813 = vmatpush.msra.mxu0 %v534_v53  ;;  %799 = vmatpush.msrb.mxu3 %v512_v56  ;;  %v584_v53 = vld [vmem:[%s2348_s3 + $0x4d0] sm:$0xff]  ;;  %v567_v56 = vld [vmem:[%s2348_s3 + $0x448] sm:$0xff]  ;;  %v685_v45 = vld [vmem:[%s2348_s3 + $0x7f8] sm:$0xff] }
  0x52   : > { %833 = vmatpush.msra.mxu1 %v550_v54  ;;  %780 = vmatpush.msrb.mxu2 %v495_v59  ;;  %v600_v54 = vld [vmem:[%s2348_s3 + $0x550] sm:$0xff]  ;;  %v615_v59 = vld [vmem:[%s2348_s3 + $0x5c8] sm:$0xff] }
  0x53   : > { %814 = vmatpush.msra.mxu0 %v533_v57  ;;  %800 = vmatpush.msrb.mxu3 %v511_v60  ;;  %v583_v57 = vld [vmem:[%s2348_s3 + $0x4c8] sm:$0xff]  ;;  %v566_v60 = vld [vmem:[%s2348_s3 + $0x440] sm:$0xff] }
  0x54   : > { %834 = vmatpush.msra.mxu1 %v549_v58  ;;  %781 = vmatpush.msrb.mxu2 %v494_v9  ;;  %v599_v58 = vld [vmem:[%s2348_s3 + $0x548] sm:$0xff] }
  0x55   : > { %815 = vmatpush.msra.mxu0 %v532_v61  ;;  %801 = vmatpush.msrb.mxu3 %v510_v10  ;;  %v582_v61 = vld [vmem:[%s2348_s3 + $0x4c0] sm:$0xff]  ;;  %v579_v9 = vld [vmem:[%s2348_s3 + $0x4a8] sm:$0xff] }
  0x56   : > { %835 = vmatpush.msra.mxu1 %v548_v62  ;;  %v598_v62 = vld [vmem:[%s2348_s3 + $0x540] sm:$0xff]  ;;  %v595_v10 = vld [vmem:[%s2348_s3 + $0x528] sm:$0xff] }
  0x57   : > { %816 = vmatpush.msra.mxu0 %v531_v63  ;;  %v614_v63 = vld [vmem:[%s2348_s3 + $0x5c0] sm:$0xff] }
  0x58   : > { %836 = vmatpush.msra.mxu1 %v547_v0  ;;  %v565_v0 = vld [vmem:[%s2348_s3 + $0x438] sm:$0xff] }
  0x59   : > { %817 = vmatpush.msra.mxu0 %v530_v1  ;;  %v581_v1 = vld [vmem:[%s2348_s3 + $0x4b8] sm:$0xff] }
  0x5a   : > { %837 = vmatpush.msra.mxu1 %v546_v2  ;;  %v597_v2 = vld [vmem:[%s2348_s3 + $0x538] sm:$0xff] }
  0x5b   : > { %818 = vmatpush.msra.mxu0 %v529_v3  ;;  %v613_v3 = vld [vmem:[%s2348_s3 + $0x5b8] sm:$0xff] }
  0x5c   : > { %838 = vmatpush.msra.mxu1 %v545_v4  ;;  %v564_v4 = vld [vmem:[%s2348_s3 + $0x430] sm:$0xff] }
  0x5d   : > { %819 = vmatpush.msra.mxu0 %v528_v5  ;;  %v580_v5 = vld [vmem:[%s2348_s3 + $0x4b0] sm:$0xff] }
  0x5e   : > { %839 = vmatpush.msra.mxu1 %v544_v6  ;;  %v596_v6 = vld [vmem:[%s2348_s3 + $0x530] sm:$0xff] }
  0x5f   : > { %820 = vmatpush.msra.mxu0 %v527_v7  ;;  %v612_v7 = vld [vmem:[%s2348_s3 + $0x5b0] sm:$0xff] }
  0x60   : > { %840 = vmatpush.msra.mxu1 %v543_v8  ;;  %v563_v8 = vld [vmem:[%s2348_s3 + $0x428] sm:$0xff] }
  0x61   : > { %821 = vmatpush.msra.mxu0 %v526_v11  ;;  %v611_v11 = vld [vmem:[%s2348_s3 + $0x5a8] sm:$0xff] }
  0x62   : > { %841 = vmatpush.msra.mxu1 %v542_v12  ;;  %v562_v12 = vld [vmem:[%s2348_s3 + $0x420] sm:$0xff] }
  0x87   : > { %v291_v22 = vpop.permute.xlu0 %290 }
  0x9f   : > { %v321_v23 = vpop.f32.mrf.mxu0 }
  0xa0   : > { %v341_v24 = vpop.f32.mrf.mxu1  ;;  %v1799_v25 = vadd.f32 %v321_v23, %v291_v22  ;;  %v593_v23 = vld [vmem:[%s2348_s3 + $0x518] sm:$0xff] }
  0xa1   : > { %v1801_v26 = vadd.f32 %v341_v24, %v291_v22  ;;  %v356_v22 = vadd.s32 1152, %v1780_v16  ;;  %v609_v24 = vld [vmem:[%s2348_s3 + $0x598] sm:$0xff] }
  0xa2   : > { %1161 = vmatmul.msk.f32.vlgmr.msra.gmra.mxu2 %vm398_vm8, %v1799_v25  ;;  %1163 = vmatmul.msk.f32.vlgmr.msrb.gmra.mxu0 %vm400_vm12, %v1799_v25  ;;  %vm404_vm8 = vmand %vm370_vm2, %vm388_vm3  ;;  %vm393_vm2 = vcmp.lt.s32.totalorder %v358_v30, %v1784_v18  ;;  %v674_v30 = vld [vmem:[%s2348_s3 + $0x7a0] sm:$0xff] }
  0xa3   : > { %1162 = vmatmul.msk.f32.vlgmr.msra.gmra.mxu3 %vm399_vm11, %v1801_v26  ;;  %1164 = vmatmul.msk.f32.vlgmr.msrb.gmra.mxu1 %vm401_vm13, %v1801_v26  ;;  %vm390_vm11 = vcmp.lt.s32.totalorder %v355_v19, %v1784_v18  ;;  %vm373_vm12 = vcmp.ge.s32.totalorder %v356_v22, %v1782_v17  ;;  %vm391_vm13 = vcmp.lt.s32.totalorder %v356_v22, %v1784_v18  ;;  %vm409_vm5 = vmand %vm375_vm1, %vm393_vm2  ;;  %v660_v19 = vld [vmem:[%s2348_s3 + $0x730] sm:$0xff]  ;;  %v643_v22 = vld [vmem:[%s2348_s3 + $0x6a8] sm:$0xff]  ;;  %vm1006_vm2 = vcmask 261120  }
  0xa4   : > { %846 = vmatpush.msra.mxu2 %v573_v28  ;;  %866 = vmatpush.msra.mxu3 %v589_v29  ;;  %v560_v28 = vld [vmem:[%s2348_s3 + $0x410] sm:$0xff]  ;;  %vm2041_vm0 = vmand %vm372_vm10, %vm390_vm11 }
  0xa5   : > { %886 = vmatpush.msrb.mxu0 %v605_v31  ;;  %906 = vmatpush.msrb.mxu1 %v621_v32  ;;  %v576_v29 = vld [vmem:[%s2348_s3 + $0x490] sm:$0xff]  ;;  %vm407_vm3 = vmand %vm373_vm12, %vm391_vm13 }
  0xa6   : > { %847 = vmatpush.msra.mxu2 %v572_v34  ;;  %867 = vmatpush.msra.mxu3 %v588_v35  ;;  %v592_v31 = vld [vmem:[%s2348_s3 + $0x510] sm:$0xff]  ;;  %v575_v34 = vld [vmem:[%s2348_s3 + $0x488] sm:$0xff] }
  0xa7   : > { %887 = vmatpush.msrb.mxu0 %v604_v37  ;;  %907 = vmatpush.msrb.mxu1 %v620_v38  ;;  %v608_v32 = vld [vmem:[%s2348_s3 + $0x590] sm:$0xff]  ;;  %v591_v35 = vld [vmem:[%s2348_s3 + $0x508] sm:$0xff]  ;;  %v558_v37 = vld [vmem:[%s2348_s3 + $0x400] sm:$0xff] }
  0xa8   : > { %848 = vmatpush.msra.mxu2 %v571_v39  ;;  %868 = vmatpush.msra.mxu3 %v587_v40  ;;  %v574_v38 = vld [vmem:[%s2348_s3 + $0x480] sm:$0xff]  ;;  %v640_v39 = vld [vmem:[%s2348_s3 + $0x690] sm:$0xff] }
  0xa9   : > { %888 = vmatpush.msrb.mxu0 %v603_v41  ;;  %908 = vmatpush.msrb.mxu1 %v619_v42  ;;  %v590_v40 = vld [vmem:[%s2348_s3 + $0x500] sm:$0xff]  ;;  %v637_v42 = vld [vmem:[%s2348_s3 + $0x678] sm:$0xff] }
  0xaa   : > { %849 = vmatpush.msra.mxu2 %v570_v43  ;;  %869 = vmatpush.msra.mxu3 %v586_v44  ;;  %v606_v41 = vld [vmem:[%s2348_s3 + $0x580] sm:$0xff]  ;;  %v653_v43 = vld [vmem:[%s2348_s3 + $0x6f8] sm:$0xff] }
  0xab   : > { %889 = vmatpush.msrb.mxu0 %v602_v46  ;;  %909 = vmatpush.msrb.mxu1 %v618_v47  ;;  %v669_v44 = vld [vmem:[%s2348_s3 + $0x778] sm:$0xff]  ;;  %v636_v46 = vld [vmem:[%s2348_s3 + $0x670] sm:$0xff] }
  0xac   : > { %1165 = vmatmul.msk.f32.vlgmr.msrb.gmra.mxu2 %vm1863_vm4, %v1799_v25  ;;  %1166 = vmatmul.msk.f32.vlgmr.msrb.gmra.mxu3 %vm403_vm7, %v1801_v26  ;;  %vm408_vm4 = vmand %vm374_vm14, %vm392_vm15  ;;  %v652_v47 = vld [vmem:[%s2348_s3 + $0x6f0] sm:$0xff] }
  0xad   : > { %1167 = vmatmul.msk.f32.vlgmr.msra.gmra.mxu0 %vm404_vm8, %v1799_v25  ;;  %1168 = vmatmul.msk.f32.vlgmr.msra.gmra.mxu1 %vm405_vm9, %v1801_v26 }
  0xae   : > { %850 = vmatpush.msra.mxu2 %v569_v48  ;;  %870 = vmatpush.msra.mxu3 %v585_v49  ;;  %v668_v48 = vld [vmem:[%s2348_s3 + $0x770] sm:$0xff] }
  0xaf   : > { %890 = vmatpush.msrb.mxu0 %v601_v50  ;;  %910 = vmatpush.msrb.mxu1 %v617_v51  ;;  %v684_v49 = vld [vmem:[%s2348_s3 + $0x7f0] sm:$0xff]  ;;  %v635_v50 = vld [vmem:[%s2348_s3 + $0x668] sm:$0xff] }
  0xb0   : > { %851 = vmatpush.msra.mxu2 %v568_v52  ;;  %871 = vmatpush.msra.mxu3 %v584_v53  ;;  %v651_v51 = vld [vmem:[%s2348_s3 + $0x6e8] sm:$0xff] }
  0xb1   : > { %891 = vmatpush.msrb.mxu0 %v600_v54  ;;  %911 = vmatpush.msrb.mxu1 %v616_v55  ;;  %v667_v52 = vld [vmem:[%s2348_s3 + $0x768] sm:$0xff]  ;;  %v634_v54 = vld [vmem:[%s2348_s3 + $0x660] sm:$0xff] }
  0xb2   : > { %852 = vmatpush.msra.mxu2 %v567_v56  ;;  %872 = vmatpush.msra.mxu3 %v583_v57  ;;  %v683_v53 = vld [vmem:[%s2348_s3 + $0x7e8] sm:$0xff]  ;;  %v650_v55 = vld [vmem:[%s2348_s3 + $0x6e0] sm:$0xff] }
  0xb3   : > { %892 = vmatpush.msrb.mxu0 %v599_v58  ;;  %912 = vmatpush.msrb.mxu1 %v615_v59  ;;  %v666_v56 = vld [vmem:[%s2348_s3 + $0x760] sm:$0xff]  ;;  %v633_v58 = vld [vmem:[%s2348_s3 + $0x658] sm:$0xff] }
  0xb4   : > { %853 = vmatpush.msra.mxu2 %v566_v60  ;;  %873 = vmatpush.msra.mxu3 %v582_v61  ;;  %v682_v57 = vld [vmem:[%s2348_s3 + $0x7e0] sm:$0xff]  ;;  %v649_v59 = vld [vmem:[%s2348_s3 + $0x6d8] sm:$0xff] }
  0xb5   : > { %893 = vmatpush.msrb.mxu0 %v598_v62  ;;  %913 = vmatpush.msrb.mxu1 %v614_v63  ;;  %v665_v60 = vld [vmem:[%s2348_s3 + $0x758] sm:$0xff]  ;;  %v632_v62 = vld [vmem:[%s2348_s3 + $0x650] sm:$0xff] }
  0xb6   : > { %854 = vmatpush.msra.mxu2 %v565_v0  ;;  %874 = vmatpush.msra.mxu3 %v581_v1  ;;  %v681_v61 = vld [vmem:[%s2348_s3 + $0x7d8] sm:$0xff]  ;;  %v648_v63 = vld [vmem:[%s2348_s3 + $0x6d0] sm:$0xff] }
  0xb7   : > { %894 = vmatpush.msrb.mxu0 %v597_v2  ;;  %914 = vmatpush.msrb.mxu1 %v613_v3  ;;  %v664_v0 = vld [vmem:[%s2348_s3 + $0x750] sm:$0xff]  ;;  %v631_v2 = vld [vmem:[%s2348_s3 + $0x648] sm:$0xff] }
  0xb8   : > { %855 = vmatpush.msra.mxu2 %v564_v4  ;;  %875 = vmatpush.msra.mxu3 %v580_v5  ;;  %v680_v1 = vld [vmem:[%s2348_s3 + $0x7d0] sm:$0xff]  ;;  %v647_v3 = vld [vmem:[%s2348_s3 + $0x6c8] sm:$0xff] }
  0xb9   : > { %895 = vmatpush.msrb.mxu0 %v596_v6  ;;  %915 = vmatpush.msrb.mxu1 %v612_v7  ;;  %v663_v4 = vld [vmem:[%s2348_s3 + $0x748] sm:$0xff]  ;;  %v630_v6 = vld [vmem:[%s2348_s3 + $0x640] sm:$0xff] }
  0xba   : > { %856 = vmatpush.msra.mxu2 %v563_v8  ;;  %876 = vmatpush.msra.mxu3 %v579_v9  ;;  %v679_v5 = vld [vmem:[%s2348_s3 + $0x7c8] sm:$0xff]  ;;  %v646_v7 = vld [vmem:[%s2348_s3 + $0x6c0] sm:$0xff] }
  0xbb   : > { %896 = vmatpush.msrb.mxu0 %v595_v10  ;;  %916 = vmatpush.msrb.mxu1 %v611_v11  ;;  %v662_v8 = vld [vmem:[%s2348_s3 + $0x740] sm:$0xff]  ;;  %v629_v10 = vld [vmem:[%s2348_s3 + $0x638] sm:$0xff] }
  0xbc   : > { %857 = vmatpush.msra.mxu2 %v562_v12  ;;  %877 = vmatpush.msra.mxu3 %v578_v13  ;;  %v678_v9 = vld [vmem:[%s2348_s3 + $0x7c0] sm:$0xff]  ;;  %v645_v11 = vld [vmem:[%s2348_s3 + $0x6b8] sm:$0xff] }
  0xbd   : > { %897 = vmatpush.msrb.mxu0 %v594_v14  ;;  %917 = vmatpush.msrb.mxu1 %v610_v15  ;;  %v661_v12 = vld [vmem:[%s2348_s3 + $0x738] sm:$0xff]  ;;  %v628_v14 = vld [vmem:[%s2348_s3 + $0x630] sm:$0xff] }
  0xbe   : > { %858 = vmatpush.msra.mxu2 %v561_v20  ;;  %878 = vmatpush.msra.mxu3 %v577_v21  ;;  %v677_v13 = vld [vmem:[%s2348_s3 + $0x7b8] sm:$0xff]  ;;  %v644_v15 = vld [vmem:[%s2348_s3 + $0x6b0] sm:$0xff]  ;;  %v627_v21 = vld [vmem:[%s2348_s3 + $0x628] sm:$0xff] }
  0xbf   : > { %898 = vmatpush.msrb.mxu0 %v593_v23  ;;  %918 = vmatpush.msrb.mxu1 %v609_v24  ;;  %v676_v20 = vld [vmem:[%s2348_s3 + $0x7b0] sm:$0xff]  ;;  %v659_v23 = vld [vmem:[%s2348_s3 + $0x728] sm:$0xff] }
  0xc0   : > { %859 = vmatpush.msra.mxu2 %v560_v28  ;;  %879 = vmatpush.msra.mxu3 %v576_v29  ;;  %v675_v24 = vld [vmem:[%s2348_s3 + $0x7a8] sm:$0xff]  ;;  %v642_v28 = vld [vmem:[%s2348_s3 + $0x6a0] sm:$0xff] }
  0xc1   : > { %899 = vmatpush.msrb.mxu0 %v592_v31  ;;  %919 = vmatpush.msrb.mxu1 %v608_v32  ;;  %v658_v29 = vld [vmem:[%s2348_s3 + $0x720] sm:$0xff]  ;;  %v359_v31 = vadd.s32 1536, %v1780_v16  ;;  %v625_v32 = vld [vmem:[%s2348_s3 + $0x618] sm:$0xff] }
  0xc2   : > { %860 = vmatpush.msra.mxu2 %v559_v33  ;;  %880 = vmatpush.msra.mxu3 %v575_v34  ;;  %v641_v33 = vld [vmem:[%s2348_s3 + $0x698] sm:$0xff]  ;;  %v360_v34 = vadd.s32 1664, %v1780_v16 }
  0xc3   : > { %900 = vmatpush.msrb.mxu0 %v591_v35  ;;  %920 = vmatpush.msrb.mxu1 %v607_v36  ;;  %v657_v35 = vld [vmem:[%s2348_s3 + $0x718] sm:$0xff]  ;;  %vm376_vm6 = vcmp.ge.s32.totalorder %v359_v31, %v1782_v17  ;;  %vm394_vm7 = vcmp.lt.s32.totalorder %v359_v31, %v1784_v18 }
  0xc4   : > { %861 = vmatpush.msra.mxu2 %v558_v37  ;;  %881 = vmatpush.msra.mxu3 %v574_v38  ;;  %v673_v36 = vld [vmem:[%s2348_s3 + $0x798] sm:$0xff]  ;;  %v361_v37 = vadd.s32 1792, %v1780_v16  ;;  %v624_v38 = vld [vmem:[%s2348_s3 + $0x610] sm:$0xff]  ;;  %vm377_vm8 = vcmp.ge.s32.totalorder %v360_v34, %v1782_v17  ;;  %vm395_vm9 = vcmp.lt.s32.totalorder %v360_v34, %v1784_v18  ;;  %vm2267_vm12 = vmand %vm376_vm6, %vm394_vm7 }
  0xc5   : > { %901 = vmatpush.msrb.mxu0 %v590_v40  ;;  %921 = vmatpush.msrb.mxu1 %v606_v41  ;;  %v362_v40 = vadd.s32 1920, %v1780_v16  ;;  %v656_v41 = vld [vmem:[%s2348_s3 + $0x710] sm:$0xff]  ;;  %v623_v16 = vld [vmem:[%s2348_s3 + $0x608] sm:$0xff]  ;;  %vm411_vm15 = vmand %vm377_vm8, %vm395_vm9 }
  0xc6   : > { %1169 = vmatmul.msk.f32.vlgmr.msra.gmra.mxu2 %vm2041_vm0, %v1799_v25  ;;  %1170 = vmatmul.msk.f32.vlgmr.msra.gmra.mxu3 %vm407_vm3, %v1801_v26  ;;  %vm378_vm10 = vcmp.ge.s32.totalorder %v361_v37, %v1782_v17  ;;  %vm396_vm11 = vcmp.lt.s32.totalorder %v361_v37, %v1784_v18 }
  0xc7   : > { %1171 = vmatmul.msk.f32.vlgmr.msrb.gmra.mxu0 %vm408_vm4, %v1799_v25  ;;  %1172 = vmatmul.msk.f32.vlgmr.msrb.gmra.mxu1 %vm409_vm5, %v1801_v26  ;;  %vm379_vm13 = vcmp.ge.s32.totalorder %v362_v40, %v1782_v17  ;;  %vm397_vm14 = vcmp.lt.s32.totalorder %v362_v40, %v1784_v18  ;;  %vm412_vm0 = vmand %vm378_vm10, %vm396_vm11  ;;  %vm1082_vm10 = vcmask 57344  }
  0xc8   : > { %926 = vmatpush.msrb.mxu2 %v637_v42  ;;  %946 = vmatpush.msrb.mxu3 %v653_v43  ;;  %v672_v42 = vld [vmem:[%s2348_s3 + $0x790] sm:$0xff]  ;;  %v639_v43 = vld [vmem:[%s2348_s3 + $0x688] sm:$0xff]  ;;  %vm413_vm1 = vmand %vm379_vm13, %vm397_vm14 }
  0xc9   : > { %966 = vmatpush.msra.mxu0 %v669_v44  ;;  %986 = vmatpush.msra.mxu1 %v685_v45  ;;  %v655_v44 = vld [vmem:[%s2348_s3 + $0x708] sm:$0xff] }
  0xca   : > { %927 = vmatpush.msrb.mxu2 %v636_v46  ;;  %947 = vmatpush.msrb.mxu3 %v652_v47  ;;  %v671_v45 = vld [vmem:[%s2348_s3 + $0x788] sm:$0xff]  ;;  %v622_v46 = vld [vmem:[%s2348_s3 + $0x600] sm:$0xff] }
  0xcb   : > { %967 = vmatpush.msra.mxu0 %v668_v48  ;;  %987 = vmatpush.msra.mxu1 %v684_v49  ;;  %v638_v47 = vld [vmem:[%s2348_s3 + $0x680] sm:$0xff] }
  0xcc   : > { %928 = vmatpush.msrb.mxu2 %v635_v50  ;;  %948 = vmatpush.msrb.mxu3 %v651_v51  ;;  %v654_v49 = vld [vmem:[%s2348_s3 + $0x700] sm:$0xff] }
  0xcd   : > { %968 = vmatpush.msra.mxu0 %v667_v52  ;;  %988 = vmatpush.msra.mxu1 %v683_v53  ;;  %v670_v50 = vld [vmem:[%s2348_s3 + $0x780] sm:$0xff] }
  0xce   : > { %929 = vmatpush.msrb.mxu2 %v634_v54  ;;  %949 = vmatpush.msrb.mxu3 %v650_v55 }
  0xcf   : > { %969 = vmatpush.msra.mxu0 %v666_v56  ;;  %989 = vmatpush.msra.mxu1 %v682_v57 }
  0xd0   : > { %930 = vmatpush.msrb.mxu2 %v633_v58  ;;  %950 = vmatpush.msrb.mxu3 %v649_v59  ;;  %v1038_v58 = vld [vmem:[%s2350_s5 + $0x18] sm:$0xff]  ;;  %v1037_v59 = vld [vmem:[%s2350_s5 + $0x10] sm:$0xff] }
  0xd1   : > { %970 = vmatpush.msra.mxu0 %v665_v60  ;;  %990 = vmatpush.msra.mxu1 %v681_v61  ;;  %v1036_v60 = vld [vmem:[%s2350_s5 + $0x8] sm:$0xff]  ;;  %v1035_v61 = vld [vmem:[%s2350_s5] sm:$0xff] }
  0xd2   : > { %931 = vmatpush.msrb.mxu2 %v632_v62  ;;  %951 = vmatpush.msrb.mxu3 %v648_v63 }
  0xd3   : > { %971 = vmatpush.msra.mxu0 %v664_v0  ;;  %991 = vmatpush.msra.mxu1 %v680_v1 }
  0xd4   : > { %932 = vmatpush.msrb.mxu2 %v631_v2  ;;  %952 = vmatpush.msrb.mxu3 %v647_v3 }
  0xd5   : > { %972 = vmatpush.msra.mxu0 %v663_v4  ;;  %992 = vmatpush.msra.mxu1 %v679_v5 }
  0xd6   : > { %933 = vmatpush.msrb.mxu2 %v630_v6  ;;  %953 = vmatpush.msrb.mxu3 %v646_v7 }
  0xd7   : > { %973 = vmatpush.msra.mxu0 %v662_v8  ;;  %993 = vmatpush.msra.mxu1 %v678_v9 }
  0xd8   : > { %934 = vmatpush.msrb.mxu2 %v629_v10  ;;  %954 = vmatpush.msrb.mxu3 %v645_v11 }
  0xd9   : > { %974 = vmatpush.msra.mxu0 %v661_v12  ;;  %994 = vmatpush.msra.mxu1 %v677_v13 }
  0xda   : > { %935 = vmatpush.msrb.mxu2 %v628_v14  ;;  %955 = vmatpush.msrb.mxu3 %v644_v15 }
  0xdb   : > { %975 = vmatpush.msra.mxu0 %v660_v19  ;;  %995 = vmatpush.msra.mxu1 %v676_v20 }
  0xdc   : > { %936 = vmatpush.msrb.mxu2 %v627_v21  ;;  %956 = vmatpush.msrb.mxu3 %v643_v22 }
  0xdd   : > { %976 = vmatpush.msra.mxu0 %v659_v23  ;;  %996 = vmatpush.msra.mxu1 %v675_v24 }
  0xde   : > { %937 = vmatpush.msrb.mxu2 %v626_v27  ;;  %957 = vmatpush.msrb.mxu3 %v642_v28 }
  0xdf   : > { %977 = vmatpush.msra.mxu0 %v658_v29  ;;  %997 = vmatpush.msra.mxu1 %v674_v30  ;;  %v1014_v29 = vld [vmem:[%s2349_s4] sm:$0x1] }
  0xe0   : > { %938 = vmatpush.msrb.mxu2 %v625_v32  ;;  %958 = vmatpush.msrb.mxu3 %v641_v33 }
  0xe1   : > { %978 = vmatpush.msra.mxu0 %v657_v35  ;;  %998 = vmatpush.msra.mxu1 %v673_v36 }
  0xe2   : > { %939 = vmatpush.msrb.mxu2 %v624_v38  ;;  %959 = vmatpush.msrb.mxu3 %v640_v39 }
  0xe3   : > { %979 = vmatpush.msra.mxu0 %v656_v41  ;;  %999 = vmatpush.msra.mxu1 %v672_v42 }
  0xe4   : > { %940 = vmatpush.msrb.mxu2 %v623_v16  ;;  %960 = vmatpush.msrb.mxu3 %v639_v43 }
  0xe5   : > { %980 = vmatpush.msra.mxu0 %v655_v44  ;;  %1000 = vmatpush.msra.mxu1 %v671_v45  ;;  %v1039_v44 = vld [vmem:[%s2351_s6] sm:$0x1] }
  0xe6   : > { %941 = vmatpush.msrb.mxu2 %v622_v46  ;;  %961 = vmatpush.msrb.mxu3 %v638_v47 }
  0xe7   : > { %981 = vmatpush.msra.mxu0 %v654_v49  ;;  %1001 = vmatpush.msra.mxu1 %v670_v50 }
  0xe8   : > { %1173 = vmatmul.msk.f32.vlgmr.msrb.gmra.mxu2 %vm2267_vm12, %v1799_v25  ;;  %1174 = vmatmul.msk.f32.vlgmr.msrb.gmra.mxu3 %vm411_vm15, %v1801_v26 }
  0xe9   : > { %1175 = vmatmul.msk.f32.vlgmr.msra.gmra.mxu0 %vm412_vm0, %v1799_v25  ;;  %1176 = vmatmul.msk.f32.vlgmr.msra.gmra.mxu1 %vm413_vm1, %v1801_v26 }
  0xea   : > { %1055 = vmatpush.msra.mxu2 %v1038_v58 }
  0xec   : > { %1056 = vmatpush.msra.mxu2 %v1037_v59 }
  0xee   : > { %1057 = vmatpush.msra.mxu2 %v1036_v60 }
  0xf0   : > { %1058 = vmatpush.msra.mxu2 %v1035_v61 }
 0x11f   : > { %v743_v17 = vpop.f32.mrf.mxu0 }
 0x120   : > { %v763_v54 = vpop.f32.mrf.mxu1 }
 0x125   : > { %v703_v51 = vpop.f32.mrf.mxu2 }
 0x126   : > { %v723_v18 = vpop.f32.mrf.mxu3 }
 0x127   : > { %v724_v52 = vadd.f32 %v723_v18, %v703_v51 }
 0x129   : > { %v744_v53 = vadd.f32 %v743_v17, %v724_v52 }
 0x12a   : > { %v823_v62 = vpop.f32.mrf.mxu0  ;;  %v843_v0 = vpop.f32.mrf.mxu1 }
 0x12b   : > { %v764_v56 = vadd.f32 %v763_v54, %v744_v53 }
 0x12f   : > { %v783_v55 = vpop.f32.mrf.mxu2  ;;  %v803_v25 = vpop.f32.mrf.mxu3 }
 0x130   : > { %v784_v57 = vadd.f32 %v783_v55, %v764_v56 }
 0x132   : > { %v804_v26 = vadd.f32 %v803_v25, %v784_v57 }
 0x134   : > { %v824_v63 = vadd.f32 %v823_v62, %v804_v26 }
 0x136   : > { %v844_v2 = vadd.f32 %v843_v0, %v824_v63 }
 0x144   : > { %v903_v6 = vpop.f32.mrf.mxu0  ;;  %v923_v8 = vpop.f32.mrf.mxu1 }
 0x149   : > { %v863_v1 = vpop.f32.mrf.mxu2  ;;  %v883_v4 = vpop.f32.mrf.mxu3 }
 0x14a   : > { %v864_v3 = vadd.f32 %v863_v1, %v844_v2 }
 0x14c   : > { %v884_v5 = vadd.f32 %v883_v4, %v864_v3 }
 0x14e   : > { %v904_v7 = vadd.f32 %v903_v6, %v884_v5 }
 0x150   : > { %v924_v9 = vadd.f32 %v923_v8, %v904_v7 }
 0x166   : > { %v983_v14 = vpop.f32.mrf.mxu0  ;;  %v1003_v19 = vpop.f32.mrf.mxu1 }
 0x16b   : > { %v943_v10 = vpop.f32.mrf.mxu2  ;;  %v963_v12 = vpop.f32.mrf.mxu3 }
 0x16c   : > { %v944_v11 = vadd.f32 %v943_v10, %v924_v9 }
 0x16e   : > { %v964_v13 = vadd.f32 %v963_v12, %v944_v11 }
 0x170   : > { %v984_v15 = vadd.f32 %v983_v14, %v964_v13 }
 0x172   : > { %v1004_v20 = vadd.f32 %v1003_v19, %v984_v15 }
 0x174   : > { %v1007_v21 = vsel %vm1006_vm2, %v1004_v20, 0.0 }
 0x175   : > { %v1008_v22 = vrot.slane %v1007_v21, 4 }
 0x177   : > { %v1009_v23 = vadd.f32 %v1008_v22, %v1007_v21 }
 0x179   : > { %v1010_v24 = vrot.slane %v1009_v23, 2 }
 0x17b   : > { %v1011_v27 = vadd.f32 %v1010_v24, %v1009_v23 }
 0x17d   : > { %v1012_v28 = vrot.slane %v1011_v27, 1 }
 0x17f   : > { %v1013_v30 = vadd.f32 %v1012_v28, %v1011_v27 }
 0x181   : > { %v1015_v31 = vadd.f32 %v1014_v29, %v1013_v30 }
 0x183   : > { %v1177_v32 = vmul.f32 -1.442695, %v1015_v31 }
 0x185   : > { %1224 = vpow2.f32 %v1177_v32 }
 0x18b   : > { %v1225_v33 = vpop.eup %1224 }
 0x18c   : > { %v1019_v34 = vadd.f32 1.0, %v1225_v33 }
 0x18e   : > { %1226 = vrcp.f32 %v1019_v34  ;;  %v1031_v38 = vand.u32 2147483648, %v1019_v34  ;;  %v1029_v40 = vand.u32 2147483647, %v1019_v34  ;;  %vm1025_vm4 = vweird.f32 %v1019_v34 }
 0x190   : > { %v1032_v42 = vor.u32 1.1754944e-38, %v1031_v38  ;;  %vm1030_vm6 = vcmp.eq.f32.partialorder %v1029_v40, 8.507059e+37 }
 0x194   : > { %v1227_v35 = vpop.eup %1226 }
 0x195   : > { %v1021_v36 = vmul.f32 %v1227_v35, %v1019_v34  ;;  %vm1026_vm3 = vweird.f32 %v1227_v35 }
 0x196   : > { %vm1027_vm5 = vmor %vm1025_vm4, %vm1026_vm3 }
 0x197   : > { %v1022_v37 = vsub.f32 1.0, %v1021_v36 }
 0x199   : > { %v1023_v39 = vmul.f32 %v1227_v35, %v1022_v37 }
 0x19b   : > { %v1024_v41 = vadd.f32 %v1227_v35, %v1023_v39 }
 0x19d   : > { %v1028_v16 = vsel %vm1027_vm5, %v1227_v35, %v1024_v41 }
 0x19e   : > { %v1033_v43 = vsel %vm1030_vm6, %v1032_v42, %v1028_v16 }
 0x19f   : > { %1178 = vmatmul.msk.f32.vlgmr.msra.gmra.mxu2 %vm1006_vm2, %v1033_v43 }
 0x222   : > { %v1060_v45 = vpop.f32.mrf.mxu2 }
 0x223   : > { %v1061_v46 = vadd.f32 %v1060_v45, %v1039_v44 }
 0x225   : > { %v1179_v47 = vmul.f32 -1.442695, %v1061_v46 }
 0x227   : > { %1228 = vpow2.f32 %v1179_v47 }
 0x22d   : > { %v1229_v48 = vpop.eup %1228 }
 0x22e   : > { %v1066_v49 = vadd.f32 1.0, %v1229_v48 }
 0x230   : > { %1230 = vrcp.f32 %v1066_v49  ;;  %v1078_v52 = vand.u32 2147483648, %v1066_v49  ;;  %v1076_v53 = vand.u32 2147483647, %v1066_v49  ;;  %vm1072_vm8 = vweird.f32 %v1066_v49 }
 0x232   : > { %v1079_v55 = vor.u32 1.1754944e-38, %v1078_v52  ;;  %vm1077_vm11 = vcmp.eq.f32.partialorder %v1076_v53, 8.507059e+37 }
 0x236   : > { %v1231_v50 = vpop.eup %1230 }
 0x237   : > { %v1068_v51 = vmul.f32 %v1231_v50, %v1066_v49  ;;  %vm1073_vm7 = vweird.f32 %v1231_v50 }
 0x238   : > { %vm1074_vm9 = vmor %vm1072_vm8, %vm1073_vm7 }
 0x239   : > { %v1069_v18 = vsub.f32 1.0, %v1068_v51 }
 0x23b   : > { %v1070_v17 = vmul.f32 %v1231_v50, %v1069_v18 }
 0x23d   : > { %v1071_v54 = vadd.f32 %v1231_v50, %v1070_v17 }
 0x23f   : > { %v1075_v56 = vsel %vm1074_vm9, %v1231_v50, %v1071_v54 }
 0x240   : > { %v1080_v57 = vsel %vm1077_vm11, %v1079_v55, %v1075_v56 }
 0x241   : > { %1083 = vst.msk [vmem:[%s270_s20] sm:$0x1] %vm1082_vm10, %v1080_v57 }
 0x242   : > { %1259 = shalt.err (!%p1256_p3)
}
 0x243   : > { %1183 = dma.vmem_to_hbm [thread:$0]  (%p1375_p5), %s1096_s21, 16, %s1098_s22, %s1085_s28  }
 0x244 PF: > { %p1189_p4 = scmp.ge.s32.totalorder %s1294_s27, 2  ;;  %s1109_s14 = sand.u32 1, %s1282_s24  }
 0x245   : > { %s1110_s15 = scalar_lea.sflag [#allocation3], %s1109_s14 }
 0x246   : > { %p1186_p7 = pnand %p1189_p4, %p1379_p6 }
 0x248   : > { %p1187_p8 = pneg %p1186_p7 }
 0x24a   : > { %1277 = dma.done.wait (%p1187_p8), %s1110_s15, 16  }
 0x24b   : > { %1279 = vsyncadd (%p1187_p8), %s1110_s15, 4294967280  ;;  %p17_p9 = scmp.ge.s32.totalorder %s1362_s30, 4   ;;  %s2361_s24 = smov %s1286_s25 }
 0x24c   : > { %s2362_s25 = smov %s1290_s26  ;;  %s2363_s26 = smov %s1373_s10 }
 0x24d   : > { %s2364_s27 = smov %s1362_s30  ;;  %19 = sbr.rel (!%p17_p9) target bundleno = 3 (0x3), region = 83 }
 0x252   :  { %1115 = vsyncpa [#allocation3], 1 }
 0x253   :  { %1117 = vsyncpa [#allocation3 + $0x1], 1 }

</bundles_post_ra>
